<compile_context>
chip_gen: v7x
topology: tpu7x:2x2x1
jax: 0.10.0
libtpu: 0.0.40
codegen_flags: <defaults>
</compile_context>

<pallas_src>
import functools

import jax
import jax.numpy as jnp
import numpy as np
from jax.experimental import pallas as pl
from jax.experimental.pallas import tpu as pltpu


def _round_up(x, m):
    return ((x + m - 1) // m) * m


def _cdiv(a, b):
    return (a + b - 1) // b


def _default_num_cores():
    """2 TensorCores only on 2-TC chips (v7x-class); 1 on v5e/v6e.

    Clamped to [1, 2] and wrapped so an unexpected TpuInfo can never break
    the grid -- correctness does not depend on this heuristic.
    """
    try:
        info = pltpu.get_tpu_info()
        for attr in ("num_cores", "tensorcores_per_chip", "num_tensorcores",
                     "core_count"):
            v = getattr(info, attr, None)
            if isinstance(v, int) and v >= 1:
                return max(1, min(2, v))
    except Exception:
        pass
    return 1


def _auto_tile(HW, C, logit_bytes, label_bytes, *, budget_bytes=24 << 20,
               max_tile=1 << 19):
    """Lane-dense pixel tile from a double-buffered VMEM byte budget."""
    per_px = C * logit_bytes + label_bytes
    t = budget_bytes // (2 * per_px)
    t = max(128, min(t, max_tile, _round_up(HW, 128)))
    return (t // 128) * 128


def _dice_ce_kernel(logits_ref, label_ref, out_ref,
                    acc_int, acc_cnt, acc_pp, acc_nll,
                    *, num_classes, has_pad):
    # logits_ref: (1, C, TILE) VMEM (f32 or bf16) ; label_ref: (1, 1, TILE) i8
    # out_ref:    (1, C, 4) f32 VMEM  (partial sums of this core-slice)
    # acc_*:      (C, 1) f32 VMEM scratch, carried across the (batch, tile) grid
    n = pl.program_id(1)
    t = pl.program_id(2)
    first = jnp.logical_and(n == 0, t == 0)
    last = jnp.logical_and(n == pl.num_programs(1) - 1,
                           t == pl.num_programs(2) - 1)

    @pl.when(first)
    def _init():
        acc_int[...] = jnp.zeros_like(acc_int)
        acc_cnt[...] = jnp.zeros_like(acc_cnt)
        acc_pp[...] = jnp.zeros_like(acc_pp)
        acc_nll[...] = jnp.zeros_like(acc_nll)

    logits = logits_ref[0].astype(jnp.float32)        # (C, TILE), upcast in-kernel
    label = label_ref[0].astype(jnp.int32)            # (1, TILE), int8 in HBM

    # ---- softmax / log-softmax over the class (sublane) axis ----
    m = jnp.max(logits, axis=0, keepdims=True)        # (1, TILE)
    shifted = logits - m
    e = jnp.exp(shifted)
    denom = jnp.sum(e, axis=0, keepdims=True)         # (1, TILE)
    # EUP approx reciprocal + one Newton step: rel. error ~1e-9 << 1e-5 tol,
    # moves the divide off the VALU slot.
    inv_denom = pl.reciprocal(denom, approx=True)
    inv_denom = inv_denom * (2.0 - denom * inv_denom)
    if has_pad:
        # Fold the pad mask into the (1, TILE) reciprocal instead of masking
        # the (C, TILE) probs -- padded pixels get probs == 0 for free.
        inv_denom = inv_denom * (label >= 0).astype(jnp.float32)
    probs = e * inv_denom                             # (C, TILE)
    neg_logp = jnp.log(denom) - shifted               # (C, TILE) == -log_softmax

    # ---- vectorized one-hot over the class axis (no per-class Python loop) ----
    cls = jax.lax.broadcasted_iota(jnp.int32, (num_classes, logits.shape[-1]), 0)
    onehot = (cls == label).astype(jnp.float32)       # padded label = -1 -> all zero

    acc_int[...] += jnp.sum(probs * onehot, axis=-1, keepdims=True)
    acc_cnt[...] += jnp.sum(onehot, axis=-1, keepdims=True)
    acc_pp[...] += jnp.sum(probs * probs, axis=-1, keepdims=True)
    acc_nll[...] += jnp.sum(onehot * neg_logp, axis=-1, keepdims=True)

    @pl.when(last)
    def _epilogue():
        # Single store instead of four width-1 masked column stores.
        out_ref[0, :, :] = jnp.concatenate(
            [acc_int[...], acc_cnt[...], acc_pp[...], acc_nll[...]], axis=-1)


def dice_ce_loss(predict, label, num_classes, alpha=1.0, *,
                 tile=None, num_cores=None, stream_dtype=None):
    """predict: (N, C, H, W) float logits (f32 or bf16); label: (N, 1, H, W) ints.

    Returns (loss, celoss, diceloss) matching SIFA's DiceCeLoss forward.
    stream_dtype=jnp.bfloat16 streams the logits at half width (biggest lever on
    HBM-bound v5e/v6e) at the cost of bf16 logit precision; default keeps the
    caller's dtype so f32 inputs match the f32 reference to 1e-5.
    """
    N, C, H, W = predict.shape
    assert C == num_classes
    HW = H * W

    if stream_dtype is not None:
        predict = predict.astype(stream_dtype)

    label_dtype = jnp.int8 if num_classes <= 127 else jnp.int32
    logit_bytes = jnp.dtype(predict.dtype).itemsize
    label_bytes = jnp.dtype(label_dtype).itemsize

    if num_cores is None:
        num_cores = _default_num_cores()
    if tile is None:
        tile = _auto_tile(HW, C, logit_bytes, label_bytes)

    # Lane-dense pixel tile (multiple of 128), well under scoped VMEM on all of
    # v5e/v6e/v7x even when double-buffered by the BlockSpec pipeline.
    tile = _round_up(max(128, min(tile, _round_up(HW, 128))), 128)
    num_tiles = _cdiv(HW, tile)
    ncore = num_cores if num_tiles >= num_cores else 1
    tiles_per_slice = _cdiv(num_tiles, ncore)
    HWp = ncore * tiles_per_slice * tile
    has_pad = HWp != HW

    # Free reshape of NCHW -> (N, C, P); no transpose, no extra HBM pass.
    logits = predict.reshape(N, C, HW)
    labels = label.reshape(N, 1, HW).astype(label_dtype)
    if has_pad:
        pad = HWp - HW
        logits = jnp.pad(logits, ((0, 0), (0, 0), (0, pad)))
        labels = jnp.pad(labels, ((0, 0), (0, 0), (0, pad)), constant_values=-1)

    kernel = functools.partial(_dice_ce_kernel, num_classes=num_classes,
                               has_pad=has_pad)

    cost = pl.CostEstimate(
        flops=int(14 * C * N * HWp),
        transcendentals=int((C + 2) * N * HWp),
        bytes_accessed=int(N * HWp * (C * logit_bytes + label_bytes)
                           + ncore * C * 4 * 4),
    )

    partials = pl.pallas_call(
        kernel,
        out_shape=jax.ShapeDtypeStruct((ncore, C, 4), jnp.float32),
        grid=(ncore, N, tiles_per_slice),
        in_specs=[
            pl.BlockSpec((1, C, tile),
                         lambda c, n, t: (n, 0, c * tiles_per_slice + t)),
            pl.BlockSpec((1, 1, tile),
                         lambda c, n, t: (n, 0, c * tiles_per_slice + t)),
        ],
        out_specs=pl.BlockSpec((1, C, 4), lambda c, n, t: (c, 0, 0)),
        scratch_shapes=[pltpu.VMEM((C, 1), jnp.float32)] * 4,
        compiler_params=pltpu.CompilerParams(
            dimension_semantics=("parallel", "arbitrary", "arbitrary"),
            vmem_limit_bytes=48 * 1024 * 1024,
        ),
        cost_estimate=cost,
    )(logits, labels)

    # Tiny scalar epilogue combining the per-core partial sums (a few dozen flops).
    sums = jnp.sum(partials, axis=0)                  # (C, 4)
    intersect = sums[:, 0]
    counts = sums[:, 1]
    sum_pp = sums[:, 2]
    nll = sums[:, 3]

    smooth = jnp.float32(1e-4)
    eps = jnp.float32(1e-5)

    dice = (2.0 * intersect + smooth) / (counts + sum_pp + smooth)
    diceloss = jnp.sum(1.0 - dice) / num_classes

    # F.cross_entropy with per-class weights, reduction='mean':
    #   sum_i w[y_i] * nll_i / sum_i w[y_i]
    counts_eps = counts + eps
    w = 1.0 - counts_eps / jnp.sum(counts_eps) + eps
    celoss = jnp.sum(w * nll) / jnp.sum(w * counts)

    loss = celoss + jnp.float32(alpha) * diceloss
    return loss, celoss, diceloss


def _reference_dice_ce(predict, label, num_classes, alpha=1.0):
    """Pure-JAX reference mirroring the PyTorch semantics."""
    probs = jax.nn.softmax(predict, axis=1)
    logp = jax.nn.log_softmax(predict, axis=1)
    lab = label[:, 0]
    smooth = 1e-4
    dice_total = 0.0
    for c in range(num_classes):
        t = (lab == c).astype(jnp.float32)
        p = probs[:, c]
        intersect = jnp.sum(p * t)
        dice = (2.0 * intersect + smooth) / (jnp.sum(t) + jnp.sum(p * p) + smooth)
        dice_total = dice_total + (1.0 - dice)
    diceloss = dice_total / num_classes
    counts = jnp.array(
        [jnp.sum(label == c) for c in range(num_classes)], jnp.float32) + 1e-5
    w = 1.0 - counts / jnp.sum(counts) + 1e-5
    nll = -jnp.take_along_axis(logp, lab[:, None], axis=1)[:, 0]
    wpix = w[lab]
    celoss = jnp.sum(wpix * nll) / jnp.sum(wpix)
    return celoss + alpha * diceloss


if __name__ == "__main__":
    num_classes = 4
    alpha = 1.0
    key = jax.random.PRNGKey(0)
    k1, k2, k3, k4 = jax.random.split(key, 4)

    # Case 1: canonical small shape (single tile, no padding), auto tile/cores.
    predict = jax.random.normal(k1, (2, num_classes, 16, 16), dtype=jnp.float32)
    label = jax.random.randint(k2, (2, 1, 16, 16), 0, num_classes, dtype=jnp.int32)
    loss, celoss, diceloss = dice_ce_loss(predict, label, num_classes, alpha)
    loss = jax.block_until_ready(loss)
    ref = _reference_dice_ce(predict, label, num_classes, alpha)
    np.testing.assert_allclose(np.asarray(loss), np.asarray(ref), rtol=1e-5, atol=1e-5)

    # Case 2: non-tile-aligned spatial size, small tile, forced 2-slice grid ->
    # exercises the padding mask and the two-core-slice ("v7x") path.
    predict2 = jax.random.normal(k3, (2, num_classes, 24, 24), dtype=jnp.float32)
    label2 = jax.random.randint(k4, (2, 1, 24, 24), 0, num_classes, dtype=jnp.int32)
    loss2, _, _ = dice_ce_loss(predict2, label2, num_classes, alpha,
                               tile=128, num_cores=2)
    loss2 = jax.block_until_ready(loss2)
    ref2 = _reference_dice_ce(predict2, label2, num_classes, alpha)
    np.testing.assert_allclose(np.asarray(loss2), np.asarray(ref2), rtol=1e-5, atol=1e-5)

    # Case 3: bf16 logits streamed from HBM (v5e/v6e bandwidth lever), upcast to
    # f32 inside the kernel; reference sees the same bf16-rounded logits.
    loss3, _, _ = dice_ce_loss(predict, label, num_classes, alpha,
                               stream_dtype=jnp.bfloat16)
    loss3 = jax.block_until_ready(loss3)
    ref3 = _reference_dice_ce(predict.astype(jnp.bfloat16).astype(jnp.float32),
                              label, num_classes, alpha)
    np.testing.assert_allclose(np.asarray(loss3), np.asarray(ref3), rtol=1e-5, atol=1e-5)

    print("KERNEL_OK")
</pallas_src>

<mosaic_0001>
module attributes {stable_mosaic.version = 11 : i64} {
  func.func @_dice_ce_kernel(%arg0: i32, %arg1: i32, %arg2: i32, %arg3: memref<1x4x256xf32, #tpu.memory_space<vmem>>, %arg4: memref<1x1x256xi8, #tpu.memory_space<vmem>>, %arg5: memref<1x4x4xf32, #tpu.memory_space<vmem>>, %arg6: memref<4x1xf32, #tpu.memory_space<vmem>>, %arg7: memref<4x1xf32, #tpu.memory_space<vmem>>, %arg8: memref<4x1xf32, #tpu.memory_space<vmem>>, %arg9: memref<4x1xf32, #tpu.memory_space<vmem>>) attributes {dimension_semantics = [#tpu.dimension_semantics<parallel>, #tpu.dimension_semantics<arbitrary>, #tpu.dimension_semantics<arbitrary>], iteration_bounds = array<i64: 1, 2, 1>, scalar_prefetch = 0 : i64, scratch_operands = 4 : i64, tpu.core_type = #tpu.core_type<tc>, window_params = [{transform_indices = @transform_0, window_bounds = array<i64: 1, 4, 256>}, {transform_indices = @transform_1, window_bounds = array<i64: 1, 1, 256>}, {transform_indices = @transform_2, window_bounds = array<i64: 1, 4, 4>}]} {
    %c0_i32 = arith.constant 0 : i32
    %0 = arith.cmpi eq, %arg1, %c0_i32 : i32
    %c0_i32_0 = arith.constant 0 : i32
    %1 = arith.cmpi eq, %arg2, %c0_i32_0 : i32
    %2 = arith.andi %0, %1 : i1
    %c1_i32 = arith.constant 1 : i32
    %3 = arith.cmpi eq, %arg1, %c1_i32 : i32
    %c0_i32_1 = arith.constant 0 : i32
    %4 = arith.cmpi eq, %arg2, %c0_i32_1 : i32
    %5 = arith.andi %3, %4 : i1
    %6 = arith.extui %2 : i1 to i32
    %c0_i32_2 = arith.constant 0 : i32
    %7 = arith.cmpi ne, %6, %c0_i32_2 : i32
    scf.if %7 {
      %cst_31 = arith.constant 0.000000e+00 : f32
      %60 = vector.broadcast %cst_31 : f32 to vector<4x1xf32>
      %c0_32 = arith.constant 0 : index
      %c0_33 = arith.constant 0 : index
      %61 = vector.load %arg6[%c0_32, %c0_33] : memref<4x1xf32, #tpu.memory_space<vmem>>, vector<4x1xf32>
      tpu.vector_store %arg6[%c0_32, %c0_33], %60 {strides = array<i32>} : memref<4x1xf32, #tpu.memory_space<vmem>>, vector<4x1xf32>,
      %cst_34 = arith.constant 0.000000e+00 : f32
      %62 = vector.broadcast %cst_34 : f32 to vector<4x1xf32>
      %c0_35 = arith.constant 0 : index
      %c0_36 = arith.constant 0 : index
      %63 = vector.load %arg7[%c0_35, %c0_36] : memref<4x1xf32, #tpu.memory_space<vmem>>, vector<4x1xf32>
      tpu.vector_store %arg7[%c0_35, %c0_36], %62 {strides = array<i32>} : memref<4x1xf32, #tpu.memory_space<vmem>>, vector<4x1xf32>,
      %cst_37 = arith.constant 0.000000e+00 : f32
      %64 = vector.broadcast %cst_37 : f32 to vector<4x1xf32>
      %c0_38 = arith.constant 0 : index
      %c0_39 = arith.constant 0 : index
      %65 = vector.load %arg8[%c0_38, %c0_39] : memref<4x1xf32, #tpu.memory_space<vmem>>, vector<4x1xf32>
      tpu.vector_store %arg8[%c0_38, %c0_39], %64 {strides = array<i32>} : memref<4x1xf32, #tpu.memory_space<vmem>>, vector<4x1xf32>,
      %cst_40 = arith.constant 0.000000e+00 : f32
      %66 = vector.broadcast %cst_40 : f32 to vector<4x1xf32>
      %c0_41 = arith.constant 0 : index
      %c0_42 = arith.constant 0 : index
      %67 = vector.load %arg9[%c0_41, %c0_42] : memref<4x1xf32, #tpu.memory_space<vmem>>, vector<4x1xf32>
      tpu.vector_store %arg9[%c0_41, %c0_42], %66 {strides = array<i32>} : memref<4x1xf32, #tpu.memory_space<vmem>>, vector<4x1xf32>,
    } else {
    }
    %c0 = arith.constant 0 : index
    %c0_3 = arith.constant 0 : index
    %c0_4 = arith.constant 0 : index
    %8 = vector.load %arg3[%c0, %c0_3, %c0_4] : memref<1x4x256xf32, #tpu.memory_space<vmem>>, vector<1x4x256xf32>
    %9 = vector.shape_cast %8 : vector<1x4x256xf32> to vector<4x256xf32>
    %c0_5 = arith.constant 0 : index
    %c0_6 = arith.constant 0 : index
    %c0_7 = arith.constant 0 : index
    %10 = vector.load %arg4[%c0_5, %c0_6, %c0_7] : memref<1x1x256xi8, #tpu.memory_space<vmem>>, vector<1x1x256xi8>
    %11 = vector.shape_cast %10 : vector<1x1x256xi8> to vector<1x256xi8>
    %12 = arith.extsi %11 : vector<1x256xi8> to vector<1x256xi32>
    %cst = arith.constant dense<0xFF800000> : vector<256xf32>
    %13 = vector.multi_reduction <maximumf>, %9, %cst [0] : vector<4x256xf32> to vector<256xf32>
    %14 = vector.shape_cast %13 : vector<256xf32> to vector<1x256xf32>
    %15 = vector.broadcast %14 : vector<1x256xf32> to vector<4x256xf32>
    %16 = arith.subf %9, %15 : vector<4x256xf32>
    %17 = math.exp %16 : vector<4x256xf32>
    %cst_8 = arith.constant dense<0.000000e+00> : vector<256xf32>
    %18 = vector.multi_reduction <add>, %17, %cst_8 [0] : vector<4x256xf32> to vector<256xf32>
    %19 = vector.shape_cast %18 : vector<256xf32> to vector<1x256xf32>
    %20 = tpu.reciprocal %19 {approx = true} : vector<1x256xf32> -> vector<1x256xf32>
    %21 = arith.mulf %19, %20 : vector<1x256xf32>
    %cst_9 = arith.constant 2.000000e+00 : f32
    %22 = vector.broadcast %cst_9 : f32 to vector<1x256xf32>
    %23 = arith.subf %22, %21 : vector<1x256xf32>
    %24 = arith.mulf %20, %23 : vector<1x256xf32>
    %25 = vector.broadcast %24 : vector<1x256xf32> to vector<4x256xf32>
    %26 = arith.mulf %17, %25 : vector<4x256xf32>
    %27 = math.log %19 : vector<1x256xf32>
    %28 = vector.broadcast %27 : vector<1x256xf32> to vector<4x256xf32>
    %29 = arith.subf %28, %16 : vector<4x256xf32>
    %30 = tpu.iota {dimensions = array<i32: 0>} : vector<4x256xi32>
    %31 = vector.broadcast %12 : vector<1x256xi32> to vector<4x256xi32>
    %32 = arith.cmpi eq, %30, %31 : vector<4x256xi32>
    %33 = arith.extui %32 : vector<4x256xi1> to vector<4x256xi32>
    %34 = arith.sitofp %33 : vector<4x256xi32> to vector<4x256xf32>
    %c0_10 = arith.constant 0 : index
    %c0_11 = arith.constant 0 : index
    %35 = vector.load %arg6[%c0_10, %c0_11] : memref<4x1xf32, #tpu.memory_space<vmem>>, vector<4x1xf32>
    %36 = arith.mulf %26, %34 : vector<4x256xf32>
    %cst_12 = arith.constant dense<0.000000e+00> : vector<4xf32>
    %37 = vector.multi_reduction <add>, %36, %cst_12 [1] : vector<4x256xf32> to vector<4xf32>
    %38 = vector.shape_cast %37 : vector<4xf32> to vector<4x1xf32>
    %39 = arith.addf %35, %38 : vector<4x1xf32>
    %c0_13 = arith.constant 0 : index
    %c0_14 = arith.constant 0 : index
    %40 = vector.load %arg6[%c0_13, %c0_14] : memref<4x1xf32, #tpu.memory_space<vmem>>, vector<4x1xf32>
    tpu.vector_store %arg6[%c0_13, %c0_14], %39 {strides = array<i32>} : memref<4x1xf32, #tpu.memory_space<vmem>>, vector<4x1xf32>,
    %c0_15 = arith.constant 0 : index
    %c0_16 = arith.constant 0 : index
    %41 = vector.load %arg7[%c0_15, %c0_16] : memref<4x1xf32, #tpu.memory_space<vmem>>, vector<4x1xf32>
    %cst_17 = arith.constant dense<0.000000e+00> : vector<4xf32>
    %42 = vector.multi_reduction <add>, %34, %cst_17 [1] : vector<4x256xf32> to vector<4xf32>
    %43 = vector.shape_cast %42 : vector<4xf32> to vector<4x1xf32>
    %44 = arith.addf %41, %43 : vector<4x1xf32>
    %c0_18 = arith.constant 0 : index
    %c0_19 = arith.constant 0 : index
    %45 = vector.load %arg7[%c0_18, %c0_19] : memref<4x1xf32, #tpu.memory_space<vmem>>, vector<4x1xf32>
    tpu.vector_store %arg7[%c0_18, %c0_19], %44 {strides = array<i32>} : memref<4x1xf32, #tpu.memory_space<vmem>>, vector<4x1xf32>,
    %c0_20 = arith.constant 0 : index
    %c0_21 = arith.constant 0 : index
    %46 = vector.load %arg8[%c0_20, %c0_21] : memref<4x1xf32, #tpu.memory_space<vmem>>, vector<4x1xf32>
    %47 = arith.mulf %26, %26 : vector<4x256xf32>
    %cst_22 = arith.constant dense<0.000000e+00> : vector<4xf32>
    %48 = vector.multi_reduction <add>, %47, %cst_22 [1] : vector<4x256xf32> to vector<4xf32>
    %49 = vector.shape_cast %48 : vector<4xf32> to vector<4x1xf32>
    %50 = arith.addf %46, %49 : vector<4x1xf32>
    %c0_23 = arith.constant 0 : index
    %c0_24 = arith.constant 0 : index
    %51 = vector.load %arg8[%c0_23, %c0_24] : memref<4x1xf32, #tpu.memory_space<vmem>>, vector<4x1xf32>
    tpu.vector_store %arg8[%c0_23, %c0_24], %50 {strides = array<i32>} : memref<4x1xf32, #tpu.memory_space<vmem>>, vector<4x1xf32>,
    %c0_25 = arith.constant 0 : index
    %c0_26 = arith.constant 0 : index
    %52 = vector.load %arg9[%c0_25, %c0_26] : memref<4x1xf32, #tpu.memory_space<vmem>>, vector<4x1xf32>
    %53 = arith.mulf %34, %29 : vector<4x256xf32>
    %cst_27 = arith.constant dense<0.000000e+00> : vector<4xf32>
    %54 = vector.multi_reduction <add>, %53, %cst_27 [1] : vector<4x256xf32> to vector<4xf32>
    %55 = vector.shape_cast %54 : vector<4xf32> to vector<4x1xf32>
    %56 = arith.addf %52, %55 : vector<4x1xf32>
    %c0_28 = arith.constant 0 : index
    %c0_29 = arith.constant 0 : index
    %57 = vector.load %arg9[%c0_28, %c0_29] : memref<4x1xf32, #tpu.memory_space<vmem>>, vector<4x1xf32>
    tpu.vector_store %arg9[%c0_28, %c0_29], %56 {strides = array<i32>} : memref<4x1xf32, #tpu.memory_space<vmem>>, vector<4x1xf32>,
    %58 = arith.extui %5 : i1 to i32
    %c0_i32_30 = arith.constant 0 : i32
    %59 = arith.cmpi ne, %58, %c0_i32_30 : i32
    scf.if %59 {
      %c0_31 = arith.constant 0 : index
      %c0_32 = arith.constant 0 : index
      %60 = vector.load %arg6[%c0_31, %c0_32] : memref<4x1xf32, #tpu.memory_space<vmem>>, vector<4x1xf32>
      %c0_33 = arith.constant 0 : index
      %c0_34 = arith.constant 0 : index
      %61 = vector.load %arg7[%c0_33, %c0_34] : memref<4x1xf32, #tpu.memory_space<vmem>>, vector<4x1xf32>
      %c0_35 = arith.constant 0 : index
      %c0_36 = arith.constant 0 : index
      %62 = vector.load %arg8[%c0_35, %c0_36] : memref<4x1xf32, #tpu.memory_space<vmem>>, vector<4x1xf32>
      %c0_37 = arith.constant 0 : index
      %c0_38 = arith.constant 0 : index
      %63 = vector.load %arg9[%c0_37, %c0_38] : memref<4x1xf32, #tpu.memory_space<vmem>>, vector<4x1xf32>
      %64 = tpu.concatenate %60, %61, %62, %63 in 1 : vector<4x1xf32>, vector<4x1xf32>, vector<4x1xf32>, vector<4x1xf32> -> vector<4x4xf32>
      %c0_39 = arith.constant 0 : index
      %c0_40 = arith.constant 0 : index
      %c0_41 = arith.constant 0 : index
      %65 = vector.load %arg5[%c0_39, %c0_40, %c0_41] : memref<1x4x4xf32, #tpu.memory_space<vmem>>, vector<1x4x4xf32>
      %66 = vector.shape_cast %65 : vector<1x4x4xf32> to vector<4x4xf32>
      %67 = vector.shape_cast %64 : vector<4x4xf32> to vector<1x4x4xf32>
      tpu.vector_store %arg5[%c0_39, %c0_40, %c0_41], %67 {strides = array<i32>} : memref<1x4x4xf32, #tpu.memory_space<vmem>>, vector<1x4x4xf32>,
    } else {
    }
    return
  }
  func.func @transform_0(%arg0: i32, %arg1: i32, %arg2: i32) -> (i32, i32, i32) {
    %c1_i32 = arith.constant 1 : i32
    %0 = arith.muli %arg0, %c1_i32 : i32
    %1 = arith.addi %0, %arg2 : i32
    %c0_i32 = arith.constant 0 : i32
    %c0_i32_0 = arith.constant 0 : i32
    return %arg1, %c0_i32, %1 : i32, i32, i32
  }
  func.func @transform_1(%arg0: i32, %arg1: i32, %arg2: i32) -> (i32, i32, i32) {
    %c1_i32 = arith.constant 1 : i32
    %0 = arith.muli %arg0, %c1_i32 : i32
    %1 = arith.addi %0, %arg2 : i32
    %c0_i32 = arith.constant 0 : i32
    %c0_i32_0 = arith.constant 0 : i32
    return %arg1, %c0_i32, %1 : i32, i32, i32
  }
  func.func @transform_2(%arg0: i32, %arg1: i32, %arg2: i32) -> (i32, i32, i32) {
    %c0_i32 = arith.constant 0 : i32
    %c0_i32_0 = arith.constant 0 : i32
    %c0_i32_1 = arith.constant 0 : i32
    return %arg0, %c0_i32, %c0_i32_0 : i32, i32, i32
  }
}

</mosaic_0001>

<bundles_post_ra>
// kernel: tpu_custom_call.1
= control target key start
LH: loop header
LB: loop body
LE: loop exit
PB: predicated region body
PF: predicated region fallthrough
CT: control target
= control target key end

     0   :  { %7 = vsyncpa [#allocation7], 0  ;;  %s897_s0 = inlined_call_operand.hbm [shape: f32[2,4,256], index: 0, kind: input, shape index: {}]   ;;  %s898_s1 = inlined_call_operand.vmem [shape: s8[2,1,256], index: 1, kind: input, shape index: {}]   ;;  %s899_s2 = inlined_call_operand.hbm [shape: f32[1,4,4], index: 2, kind: output, shape index: {}]  }
   0x1   :  { %9 = vsyncpa [#allocation7 + $0x1], 0 }
   0x2   :  { %10 = vsyncpa [#allocation8], 0  ;;  %s723_s9 = smov 0   ;;  %s725_s10 = smov 0  }
   0x3   :  { %s727_s11 = smov 0   ;;  %s729_s12 = smov 0  }
   0x4   :  { %s731_s13 = smov 0   ;;  %s733_s14 = smov 0  }
   0x5 LB: > { %s491_s15 = sadd.s32 4294967295, %s699_s14   ;;  %s31_s16 = sadd.s32 1, %s695_s13  ;;  %s699_s14 = sphi %s733_s14, %s16_s14   ;;  %s695_s13 = sphi %s731_s13, %s910_s13   ;;  %s691_s12 = sphi %s729_s12, %s909_s12   ;;  %s687_s11 = sphi %s727_s11, %s908_s11   ;;  %s683_s10 = sphi %s725_s10, %s907_s10   ;;  %s679_s9 = sphi %s723_s9, %s906_s9  }
   0x6   : > { %p33_p0 = scmp.ge.s32.totalorder %s31_s16, 2  ;;  %s46_s17 = sadd.s32 1, %s687_s11 }
   0x7   : > { %p53_p1 = scmp.ne.s32.totalorder %s687_s11, %s683_s10  ;;  %p54_p2 = scmp.eq.s32.totalorder %s699_s14, 0 }
   0x8   : > { %s912_s16 = smov (%p33_p0, %s31_s16), 0  ;;  %p59_p4 = scmp.ne.s32.totalorder %s683_s10, %s679_s9 }
   0x9   : > { %p759_p3 = por %p54_p2, %p53_p1  ;;  %s41_s19 = ssub.s32 %s695_s13, %s912_s16 }
   0xa   : > { %p60_p5 = scmp.eq.s32.totalorder %s491_s15, 0  ;;  %p44_p6 = scmp.eq.s32.totalorder %s41_s19, 0 }
   0xb   : > { %p521_p8 = scmp.lt.s32.totalorder %s699_s14, 2  ;;  %s139_s22 = sand.u32 1, %s687_s11  }
   0xc   : > { %p768_p7 = por %p60_p5, %p59_p4  ;;  %s508_s23 = sshll.u32 %s695_s13, 7 }
   0xd   : > { %s774_s21 = scalar_select %p44_p6, %s687_s11, %s46_s17  }
   0xe   : > { %s494_s24 = sshll.u32 %s139_s22, 3  ;;  %s781_s27 = scalar_lea.hbm %s897_s0, %s508_s23 }
   0xf   : > { %s143_s28 = scalar_lea.vmem [#allocation6], %s494_s24  ;;  %p785_p9 = pnand %p521_p8, %p759_p3 }
  0x10   : > { %s154_s29 = sshll.u32 %s143_s28, 4  ;;  %s140_s3 = scalar_lea.sflag [#allocation7], %s139_s22  ;;  %s789_s29 = int_to_ptr.vmem [resolvable:$true] %s154_s29 }
  0x11   : > { %s589_s4 = scalar_lea.hbm %s781_s27, 128  ;;  %p591_p13 = pneg %p785_p9 }
  0x12   : > { %p590_p12 = scmp.ne.s32.totalorder %s781_s27, %s589_s4  ;;  %s594_s7 = scalar_lea.hbm %s897_s0, 256 }
  0x13   : > { %p595_p2 = scmp.lt.u32.totalorder %s781_s27, %s897_s0  ;;  %p596_p3 = scmp.lt.u32.totalorder %s594_s7, %s589_s4 }
  0x14   : > { %p592_p0 = pnand %p591_p13, %p590_p12  ;;  %p598_p5 = scmp.lt.u32.totalorder %s589_s4, %s781_s27 }
  0x15   : > { %p597_p4 = por %p596_p3, %p595_p2 }
  0x16   : > { %p593_p1 = pneg %p592_p0 }
  0x17   : > { %p599_p6 = por %p598_p5, %p597_p4 }
  0x19   : > { %p600_p8 = pnand %p599_p6, %p593_p1 }
  0x1b   : > { %603 = shalt.err (!%p600_p8)
}
  0x1c   : > { %s604_s17 = scalar_lea.vmem %s789_s29, 128  ;;  %s701_s18 = smov [#allocation6]  }
  0x1d   : > { %p605_p12 = scmp.ne.s32.totalorder %s789_s29, %s604_s17  ;;  %s609_s19 = sshll.u32 %s701_s18, 4  ;;  %s610_s19 = int_to_ptr.vmem [resolvable:$false] %s609_s19 }
  0x1e   : > { %s611_s22 = scalar_lea.vmem %s610_s19, 256  ;;  %p612_p11 = scmp.lt.s32.totalorder %s789_s29, %s610_s19 }
  0x1f   : > { %p607_p0 = pnand %p605_p12, %p591_p13  ;;  %p613_p2 = scmp.lt.s32.totalorder %s611_s22, %s604_s17 }
  0x21   : > { %p608_p10 = pneg %p607_p0  ;;  %p614_p3 = por %p613_p2, %p612_p11 }
  0x23   : > { %p615_p4 = pnand %p614_p3, %p608_p10 }
  0x25   : > { %618 = shalt.err (!%p615_p4)
}
  0x26   : > { %520 = dma.hbm_to_vmem [thread:$0]  (!%p785_p9), %s781_s27, 128, %s789_s29, %s140_s3  }
  0x27   : > { %p903_p1 = scmp.lt.s32.totalorder %s699_s14, 3  ;;  %p904_p5 = scmp.ge.s32.totalorder %s699_s14, 1 }
  0x29   : > { %p174_p13 = pnand %p904_p5, %p903_p1 }
  0x2a   : > { %s179_s23 = sand.u32 (!%p174_p13), 1, %s683_s10  }
  0x2b   : > { %177 = sbr.rel (%p174_p13) target bundleno = 440 (0x1b8), region = 28  ;;  %s498_s24 = sshll.u32 (!%p174_p13), %s179_s23, 3 }
  0x2c   : > { %s180_s25 = scalar_lea.sflag (!%p174_p13), [#allocation7], %s179_s23  ;;  %s183_s26 = scalar_lea.vmem (!%p174_p13), [#allocation6], %s498_s24 }
  0x32   : > { %670 = dma.done.wait (%p768_p7), %s180_s25, 128  }
  0x33   : > { %672 = vsyncadd (%p768_p7), %s180_s25, 4294967168  ;;  %p212_p9 = scmp.lt.s32.totalorder %s691_s12, 1  ;;  %p221_p10 = scmp.eq.s32.totalorder %s691_s12, 0 }
  0x34   : > { %p225_p11 = scmp.eq.s32.totalorder %s691_s12, 1  ;;  %vm230_vm0 = vcmask (%p221_p10), 3072   ;;  %v702_v0 = vmov (%p221_p10), 0.0  }
  0x35   : > { %s213_s27 = scalar_select %p212_p9, %s691_s12, 1 }
  0x36   : > { %229 = sbr.rel (!%p221_p10) target bundleno = 61 (0x3d), region = 36  ;;  %231 = vst.msk [vmem:[#allocation2] sm:$0xf] (%p221_p10), %vm230_vm0, %v702_v0  ;;  %232 = vst.msk [vmem:[#allocation3] sm:$0xf] (%p221_p10), %vm230_vm0, %v702_v0 }
  0x37   : > { %s499_s28 = sshll.u32 %s213_s27, 1  ;;  %233 = vst.msk [vmem:[#allocation4] sm:$0xf] (%p221_p10), %vm230_vm0, %v702_v0  ;;  %234 = vst.msk [vmem:[#allocation5] sm:$0xf] (%p221_p10), %vm230_vm0, %v702_v0 }
  0x38   : > { %s834_s3 = scalar_lea.vmem %s898_s1, %s499_s28 }
  0x3d PF: > { %v235_v1 = vld [vmem:[%s183_s26] sm:$0xff]  ;;  %vm241_vm1 = vcmask 1043456   ;;  %v302_v29 = vlaneseq  ;;  %v236_v37 = vld [vmem:[%s834_s3] sm:$0x3]  ;;  %v703_v58 = vmov 0.0   ;;  %vm341_vm4 = vcmask 3072  }
  0x3e   : > { %v239_v2 = vcombine.high %v235_v1, %v235_v1  ;;  %v242_v3 = vsel %vm241_vm1, %v235_v1, -inf  ;;  %v237_v39 = vunpack.c.0.s8 %v236_v37  ;;  %s704_s20 = smov (%p225_p11), 1   ;;  %s705_s4 = smov (%p225_p11), 3   ;;  %vm391_vm5 = vcmask (%p225_p11), 7168  }
  0x3f   : > { %v243_v4 = vrot.slane %v242_v3, 4  ;;  %v303_v34 = vshrl.u32 %v302_v29, 7  ;;  %s706_s5 = smov (%p225_p11), 2   ;;  %vm393_vm6 = vcmask (%p225_p11), 15360   ;;  %vm395_vm7 = vcmask (%p225_p11), 23552  }
  0x40   : > { %v249_v5 = vsel %vm241_vm1, %v239_v2, -inf  ;;  %vm397_vm8 = vcmask (%p225_p11), 27648  }
  0x41   : > { %v244_v6 = vmax.f32 %v242_v3, %v243_v4  ;;  %v250_v7 = vrot.slane %v249_v5, 4  ;;  %v306_v40 = vsub.s32 0, %v303_v34  ;;  %v310_v41 = vsub.s32 4, %v303_v34 }
  0x43   : > { %v245_v8 = vrot.slane %v244_v6, 2  ;;  %v251_v9 = vmax.f32 %v249_v5, %v250_v7  ;;  %v307_v42 = vrot.slane %v237_v39, %v306_v40  ;;  %v311_v43 = vrot.slane %v237_v39, %v310_v41 }
  0x45   : > { %v246_v10 = vmax.f32 %v244_v6, %v245_v8  ;;  %v252_v11 = vrot.slane %v251_v9, 2  ;;  %v315_v44 = vrot.slane %v307_v42, %v306_v40  ;;  %v319_v45 = vrot.slane %v311_v43, %v306_v40 }
  0x47   : > { %v247_v12 = vrot.slane %v246_v10, 1  ;;  %v253_v13 = vmax.f32 %v251_v9, %v252_v11  ;;  %vm320_vm2 = vcmp.eq.s32.totalorder %v303_v34, %v315_v44  ;;  %vm321_vm3 = vcmp.eq.s32.totalorder %v303_v34, %v319_v45 }
  0x48   : > { %v502_v59 = vsel %vm320_vm2, 1.0, %v703_v58  ;;  %v503_v60 = vsel %vm321_vm3, 1.0, %v703_v58 }
  0x49   : > { %v248_v14 = vmax.f32 %v246_v10, %v247_v12  ;;  %v254_v15 = vrot.slane %v253_v13, 1  ;;  %v329_v63 = vcombine.low %v502_v59, %v503_v60  ;;  %v344_v11 = vsel %vm241_vm1, %v502_v59, 0.0 }
  0x4a   : > { %v345_v12 = vsel %vm241_vm1, %v503_v60, 0.0 }
  0x4b   : > { %v255_v16 = vmax.f32 %v253_v13, %v254_v15 }
  0x4d   : > { %v258_v17 = vcombine.low %v248_v14, %v255_v16 }
  0x4f   : > { %v260_v18 = vsub.f32 %v235_v1, %v258_v17 }
  0x51   : > { %v261_v19 = vmul.f32 1.442695, %v260_v18  ;;  %v298_v53 = vcombine.high %v260_v18, %v260_v18 }
  0x53   : > { %579 = vpow2.f32 %v261_v19 }
  0x5d   : > { %v580_v20 = vpop.eup %579 }
  0x5e   : > { %v264_v21 = vcombine.high %v580_v20, %v580_v20  ;;  %v266_v22 = vsel %vm241_vm1, %v580_v20, 0.0 }
  0x5f   : > { %v267_v23 = vrot.slane %v266_v22, 4 }
  0x60   : > { %v273_v24 = vsel %vm241_vm1, %v264_v21, 0.0  ;;  %v351_v21 = vld [vmem:[#allocation4] sm:$0xf] }
  0x61   : > { %v268_v25 = vadd.f32 %v267_v23, %v266_v22  ;;  %v274_v26 = vrot.slane %v273_v24, 4  ;;  %v326_v22 = vld [vmem:[#allocation2] sm:$0xf] }
  0x63   : > { %v269_v27 = vrot.slane %v268_v25, 2  ;;  %v275_v28 = vadd.f32 %v274_v26, %v273_v24 }
  0x65   : > { %v270_v30 = vadd.f32 %v269_v27, %v268_v25  ;;  %v276_v31 = vrot.slane %v275_v28, 2  ;;  %v363_v27 = vld [vmem:[#allocation5] sm:$0xf] }
  0x67   : > { %v271_v32 = vrot.slane %v270_v30, 1  ;;  %v277_v33 = vadd.f32 %v276_v31, %v275_v28  ;;  %v343_v28 = vld [vmem:[#allocation3] sm:$0xf] }
  0x69   : > { %v272_v35 = vadd.f32 %v271_v32, %v270_v30  ;;  %v278_v36 = vrot.slane %v277_v33, 1 }
  0x6b   : > { %v279_v38 = vadd.f32 %v278_v36, %v277_v33  ;;  %581 = vrcp.f32 %v272_v35 }
  0x6c   : > { %583 = vlog2.f32 %v272_v35 }
  0x6d   : > { %585 = vrcp.f32 %v279_v38 }
  0x6e   : > { %587 = vlog2.f32 %v279_v38 }
  0x75   : > { %v582_v46 = vpop.eup %581 }
  0x76   : > { %v584_v47 = vpop.eup %583  ;;  %v282_v48 = vmul.f32 %v582_v46, %v272_v35 }
  0x77   : > { %v586_v49 = vpop.eup %585  ;;  %v294_v56 = vmul.f32 0.6931472, %v584_v47 }
  0x78   : > { %v588_v50 = vpop.eup %587  ;;  %v283_v51 = vmul.f32 %v586_v49, %v279_v38  ;;  %v284_v52 = vsub.f32 2.0, %v282_v48 }
  0x79   : > { %v296_v57 = vmul.f32 0.6931472, %v588_v50  ;;  %v300_v0 = vsub.f32 %v294_v56, %v260_v18 }
  0x7a   : > { %v285_v54 = vsub.f32 2.0, %v283_v51  ;;  %v286_v55 = vmul.f32 %v582_v46, %v284_v52 }
  0x7b   : > { %v301_v1 = vsub.f32 %v296_v57, %v298_v53  ;;  %v364_v5 = vmul.f32 %v502_v59, %v300_v0 }
  0x7c   : > { %v287_v61 = vmul.f32 %v586_v49, %v285_v54 }
  0x7d   : > { %v365_v6 = vmul.f32 %v503_v60, %v301_v1  ;;  %v366_v15 = vsel %vm241_vm1, %v364_v5, 0.0 }
  0x7e   : > { %v290_v62 = vcombine.low %v286_v55, %v287_v61 }
  0x7f   : > { %v367_v16 = vsel %vm241_vm1, %v365_v6, 0.0 }
  0x80   : > { %v292_v2 = vmul.f32 %v580_v20, %v290_v62  ;;  %v368_v19 = vadd.f32 %v367_v16, %v366_v15  ;;  %v346_v20 = vadd.f32 %v345_v12, %v344_v11 }
  0x82   : > { %v352_v3 = vmul.f32 %v292_v2, %v292_v2  ;;  %v331_v4 = vmul.f32 %v329_v63, %v292_v2 }
  0x84   : > { %v354_v7 = vcombine.high %v352_v3, %v352_v3  ;;  %v356_v8 = vsel %vm241_vm1, %v352_v3, 0.0  ;;  %v333_v9 = vcombine.high %v331_v4, %v331_v4  ;;  %v335_v10 = vsel %vm241_vm1, %v331_v4, 0.0 }
  0x86   : > { %v357_v13 = vsel %vm241_vm1, %v354_v7, 0.0  ;;  %v336_v14 = vsel %vm241_vm1, %v333_v9, 0.0 }
  0x87   : > { %v358_v17 = vadd.f32 %v357_v13, %v356_v8  ;;  %v337_v18 = vadd.f32 %v336_v14, %v335_v10 }
  0x89   : > { %359 = vadd.xlane.f32.xlu1 %v358_v17  ;;  %338 = vadd.xlane.f32.xlu0 %v337_v18 }
  0x8d   : > { %369 = vadd.xlane.f32.xlu1 %v368_v19  ;;  %347 = vadd.xlane.f32.xlu0 %v346_v20 }
 0x116   : > { %v360_v23 = vpop.xlane.xlu1 %359  ;;  %v339_v24 = vpop.xlane.xlu0 %338 }
 0x117   : > { %v361_v25 = vadd.f32 %v360_v23, %v351_v21  ;;  %v340_v26 = vadd.f32 %v339_v24, %v326_v22  ;;  %374 = sbr.rel (!%p225_p11) target bundleno = 415 (0x19f), region = 40 }
 0x119   : > { %362 = vst.msk [vmem:[#allocation4] sm:$0xf] %vm341_vm4, %v361_v25  ;;  %342 = vst.msk [vmem:[#allocation2] sm:$0xf] %vm341_vm4, %v340_v26 }
 0x11a   : > { %v370_v29 = vpop.xlane.xlu1 %369  ;;  %v348_v30 = vpop.xlane.xlu0 %347 }
 0x11b   : > { %v371_v31 = vadd.f32 %v370_v29, %v363_v27  ;;  %v349_v32 = vadd.f32 %v348_v30, %v343_v28 }
 0x11d   : > { %372 = vst.msk [vmem:[#allocation5] sm:$0xf] %vm341_vm4, %v371_v31  ;;  %350 = vst.msk [vmem:[#allocation3] sm:$0xf] %vm341_vm4, %v349_v32 }
 0x120   : > { %v377_v35 = vld [vmem:[#allocation4] sm:$0xf]  ;;  %v375_v37 = vld [vmem:[#allocation2] sm:$0xf] }
 0x124   : > { %v376_v33 = vld [vmem:[#allocation3] sm:$0xf]  ;;  %v378_v34 = vld [vmem:[#allocation5] sm:$0xf] }
 0x125   : > { %380 = vrot.lane.b32.xlu0 %v376_v33, %s704_s20  ;;  %388 = vrot.lane.b32.xlu1 %v378_v34, %s705_s4 }
 0x129   : > { %384 = vrot.lane.b32.xlu0 %v377_v35, %s706_s5 }
 0x197   : > { %v381_v36 = vpop.permute.xlu0 %380  ;;  %v389_v38 = vpop.permute.xlu1 %388 }
 0x198   : > { %v392_v39 = vsel %vm391_vm5, %v375_v37, %v381_v36 }
 0x19b   : > { %v385_v40 = vpop.permute.xlu0 %384 }
 0x19c   : > { %v394_v41 = vsel %vm393_vm6, %v392_v39, %v385_v40 }
 0x19d   : > { %v396_v42 = vsel %vm395_vm7, %v394_v41, %v389_v38 }
 0x19e   : > { %398 = vst.msk [vmem:[#allocation9] sm:$0xf] %vm397_vm8, %v396_v42 }
 0x19f PF: > { %p853_p7 = scmp.eq.s32.totalorder %s491_s15, 1  ;;  %s707_s6 = smov [#allocation9]  }
 0x1a0   : > { %s408_s7 = sshll.u32 %s707_s6, 4  ;;  %s409_s7 = int_to_ptr.vmem [resolvable:$true] %s408_s7 }
 0x1a1   : > { %s619_s8 = scalar_lea.vmem %s409_s7, 64  ;;  %p626_p0 = scmp.lt.s32.totalorder %s409_s7, %s409_s7 }
 0x1a2   : > { %p620_p6 = scmp.ne.s32.totalorder %s409_s7, %s619_s8  ;;  %p627_p2 = scmp.lt.s32.totalorder %s619_s8, %s619_s8 }
 0x1a4   : > { %p621_p8 = pnand %p620_p6, %p853_p7  ;;  %p628_p3 = por %p627_p2, %p626_p0 }
 0x1a6   : > { %p622_p12 = pneg %p621_p8 }
 0x1a8   : > { %p629_p4 = pnand %p628_p3, %p622_p12 }
 0x1aa   : > { %632 = shalt.err (!%p629_p4)
}
 0x1ab   : > { %s633_s15 = scalar_lea.hbm %s899_s2, 64 }
 0x1ac   : > { %p634_p1 = scmp.ne.s32.totalorder %s899_s2, %s633_s15  ;;  %p639_p9 = scmp.lt.u32.totalorder %s633_s15, %s899_s2 }
 0x1ae   : > { %p635_p5 = pnand %p634_p1, %p853_p7 }
 0x1b0   : > { %p636_p13 = pneg %p635_p5 }
 0x1b2   : > { %p641_p10 = pnand %p639_p9, %p636_p13 }
 0x1b4   : > { %644 = shalt.err (!%p641_p10)
}
 0x1b5   : > { %514 = dma.vmem_to_hbm [thread:$0]  (%p853_p7), %s409_s7, 64, %s899_s2, [#allocation8]  }
 0x1b6   : > { %674 = dma.done.wait (%p853_p7), [#allocation8], 64  }
 0x1b7   : > { %676 = vsyncadd (%p853_p7), [#allocation8], 4294967232 }
 0x1b8 PF: > { %s16_s14 = sadd.s32 1, %s699_s14   ;;  %s906_s9 = smov %s683_s10 }
 0x1b9   : > { %p13_p11 = scmp.ge.s32.totalorder %s16_s14, 4   ;;  %s907_s10 = smov %s687_s11 }
 0x1ba   : > { %s908_s11 = smov %s774_s21  ;;  %s909_s12 = smov %s695_s13 }
 0x1bb   : > { %s910_s13 = smov %s912_s16  ;;  %15 = sbr.rel (!%p13_p11) target bundleno = 5 (0x5), region = 77 }
 0x1c2   :  { %421 = vsyncpa [#allocation7], 1 }
 0x1c3   :  { %423 = vsyncpa [#allocation7 + $0x1], 1 }
 0x1c4   :  { %424 = vsyncpa [#allocation8], 1 }
 0x1c5   :  { %426 = vsyncpa [#allocation8 + $0x1], 1 }

</bundles_post_ra>
